<compile_context>
chip_gen: v7x
topology: tpu7x:2x2x1
jax: 0.10.0
libtpu: 0.0.40
codegen_flags: <defaults>
</compile_context>

<pallas_src>
import functools

import jax
import jax.numpy as jnp
from jax.experimental import pallas as pl
from jax.experimental.pallas import tpu as pltpu

PF = 32                      # predictive_factor
EMB = 2 * PF                 # embedding dim = 64
MLP_H1 = 2 * PF              # 64
MLP_H2 = PF                  # 32
MLP_H3 = PF // 2             # 16

ALIGN = 16                   # sublane alignment safe for bf16 (16,128) packing


def _round_up(x, m):
    return ((x + m - 1) // m) * m


def ncf_kernel(gu_ref, gi_ref, mu_ref, mi_ref,
               w1u_ref, w1i_ref, b1_ref,
               w2_ref, b2_ref,
               w3_ref, b3_ref,
               wg_ref, wm_ref, bo_ref,
               out_ref):
    f32 = jnp.float32
    bf16 = jnp.bfloat16

    # ---- GMF branch: elementwise product in f32 (v5e VPU has no bf16) -------
    gmf = gu_ref[...].astype(f32) * gi_ref[...].astype(f32)          # (TB, 64)

    # ---- MLP branch: split first layer, bf16 MXU dots, f32 accumulation -----
    h1 = (jnp.dot(mu_ref[...], w1u_ref[...], preferred_element_type=f32)
          + jnp.dot(mi_ref[...], w1i_ref[...], preferred_element_type=f32)
          + b1_ref[...])
    h1 = jnp.maximum(h1, 0.0)                                        # (TB, 64)

    h2 = jnp.dot(h1.astype(bf16), w2_ref[...],
                 preferred_element_type=f32) + b2_ref[...]
    h2 = jnp.maximum(h2, 0.0)                                        # (TB, 32)

    h3 = jnp.dot(h2.astype(bf16), w3_ref[...],
                 preferred_element_type=f32) + b3_ref[...]
    h3 = jnp.maximum(h3, 0.0)                                        # (TB, 16)

    # ---- output_logits on concat([gmf, mlp]) with blended weights -----------
    # weight = [0.5 * gmf_out.W | 0.5 * mlp_out.W], bias = output_logits.bias.
    # Two small MXU dots instead of cross-lane reductions.
    logit = (jnp.dot(gmf, wg_ref[...], preferred_element_type=f32)
             + jnp.dot(h3, wm_ref[...], preferred_element_type=f32)
             + bo_ref[...])                                          # (TB, 1)
    out_ref[...] = logit


def make_params(key, user_num, item_num):
    ks = jax.random.split(key, 12)
    p = {}
    bf16 = jnp.bfloat16
    # embeddings ~ N(0, 0.01), stored bf16
    p["mlp_user_emb"] = (0.01 * jax.random.normal(ks[0], (user_num, EMB))).astype(bf16)
    p["mlp_item_emb"] = (0.01 * jax.random.normal(ks[1], (item_num, EMB))).astype(bf16)
    p["gmf_user_emb"] = (0.01 * jax.random.normal(ks[2], (user_num, EMB))).astype(bf16)
    p["gmf_item_emb"] = (0.01 * jax.random.normal(ks[3], (item_num, EMB))).astype(bf16)

    def xavier(k, fan_in, fan_out):
        lim = (6.0 / (fan_in + fan_out)) ** 0.5
        return jax.random.uniform(k, (fan_in, fan_out), jnp.float32, -lim, lim)

    # MLP: Linear(128->64) split into user/item halves, Linear(64->32),
    # Linear(32->16); matmul weights stored bf16, biases f32.
    w1 = xavier(ks[4], 2 * EMB, MLP_H1)
    p["w1u"] = w1[:EMB, :].astype(bf16)
    p["w1i"] = w1[EMB:, :].astype(bf16)
    p["b1"] = jnp.zeros((1, MLP_H1), jnp.float32)
    p["w2"] = xavier(ks[5], MLP_H1, MLP_H2).astype(bf16)
    p["b2"] = jnp.zeros((1, MLP_H2), jnp.float32)
    p["w3"] = xavier(ks[6], MLP_H2, MLP_H3).astype(bf16)
    p["b3"] = jnp.zeros((1, MLP_H3), jnp.float32)

    # gmf_out: Linear(64->1), mlp_out: Linear(16->1) (kaiming-ish uniform), f32
    p["gmf_out_w"] = jax.random.uniform(ks[7], (1, EMB), jnp.float32, -0.3, 0.3)
    p["mlp_out_w"] = jax.random.uniform(ks[8], (1, MLP_H3), jnp.float32, -0.3, 0.3)
    # output_logits bias (original Linear(PF -> 1) bias)
    p["out_bias"] = jax.random.uniform(ks[9], (1, 1), jnp.float32, -0.1, 0.1)
    return p


@functools.partial(jax.jit, static_argnames=("tb",))
def ncf_forward(params, x, tb=2048):
    """x: (B, 2) int32 with columns [user_id, item_id]. Returns (B,) float32."""
    B = x.shape[0]
    user_id = x[:, 0]
    item_id = x[:, 1]

    # ---- batch tiling: >= 2 grid steps when possible (v7x dual-TC) ----------
    B_al = _round_up(B, ALIGN)
    TB = min(tb, _round_up(pl.cdiv(B_al, 2), ALIGN))
    TB = max(TB, ALIGN)
    B_pad = _round_up(B, TB)
    grid = (B_pad // TB,)

    # Pad the (cheap) int32 ids, not the gathered activations.
    pad = B_pad - B
    if pad:
        user_id = jnp.pad(user_id, (0, pad))   # id 0 rows; sliced off below
        item_id = jnp.pad(item_id, (0, pad))

    # glue: embedding gathers (data-dependent row lookup), bf16 rows
    # TODO(synk): in-kernel fused gather (scalar-prefetched ids) — see header.
    gu = jnp.take(params["gmf_user_emb"], user_id, axis=0)           # (B_pad, 64)
    gi = jnp.take(params["gmf_item_emb"], item_id, axis=0)
    mu = jnp.take(params["mlp_user_emb"], user_id, axis=0)
    mi = jnp.take(params["mlp_item_emb"], item_id, axis=0)

    # join_output_weights(): blended output weights, split gmf / mlp halves,
    # transposed to (K, 1) so the kernel uses MXU dots.
    blend = 0.5
    wg = (blend * params["gmf_out_w"]).T                 # (64, 1) f32
    wm = ((1.0 - blend) * params["mlp_out_w"]).T         # (16, 1) f32

    def act_spec(d):
        return pl.BlockSpec((TB, d), lambda i: (i, 0))

    def const_spec(shape):
        # Constant index_map -> weight block stays VMEM-resident across steps.
        return pl.BlockSpec(shape, lambda i: (0, 0))

    flops = 2 * B_pad * (2 * EMB * MLP_H1 + MLP_H1 * MLP_H2 + MLP_H2 * MLP_H3
                         + EMB + MLP_H3) + B_pad * EMB
    weight_bytes = (2 * (2 * EMB * MLP_H1 + MLP_H1 * MLP_H2 + MLP_H2 * MLP_H3)
                    + 4 * (MLP_H1 + MLP_H2 + MLP_H3 + EMB + MLP_H3 + 1))
    bytes_accessed = 2 * B_pad * 4 * EMB + 4 * B_pad + weight_bytes

    out = pl.pallas_call(
        ncf_kernel,
        out_shape=jax.ShapeDtypeStruct((B_pad, 1), jnp.float32),
        grid=grid,
        in_specs=[
            act_spec(EMB),                      # gu
            act_spec(EMB),                      # gi
            act_spec(EMB),                      # mu
            act_spec(EMB),                      # mi
            const_spec((EMB, MLP_H1)),          # w1u
            const_spec((EMB, MLP_H1)),          # w1i
            const_spec((1, MLP_H1)),            # b1
            const_spec((MLP_H1, MLP_H2)),       # w2
            const_spec((1, MLP_H2)),            # b2
            const_spec((MLP_H2, MLP_H3)),       # w3
            const_spec((1, MLP_H3)),            # b3
            const_spec((EMB, 1)),               # wg (blended gmf half, transposed)
            const_spec((MLP_H3, 1)),            # wm (blended mlp half, transposed)
            const_spec((1, 1)),                 # out bias
        ],
        out_specs=pl.BlockSpec((TB, 1), lambda i: (i, 0)),
        compiler_params=pltpu.CompilerParams(
            dimension_semantics=("parallel",),
            vmem_limit_bytes=32 * 1024 * 1024,
        ),
        cost_estimate=pl.CostEstimate(
            flops=flops, transcendentals=0, bytes_accessed=bytes_accessed),
    )(gu, gi, mu, mi,
      params["w1u"], params["w1i"], params["b1"],
      params["w2"], params["b2"],
      params["w3"], params["b3"],
      wg, wm, params["out_bias"])

    return out[:B, 0]


def ncf_forward_ref(params, x):
    """Pure-JAX f32 reference mirroring the PyTorch forward (same bf16 params)."""
    f32 = jnp.float32
    user_id, item_id = x[:, 0], x[:, 1]
    gu = jnp.take(params["gmf_user_emb"], user_id, axis=0).astype(f32)
    gi = jnp.take(params["gmf_item_emb"], item_id, axis=0).astype(f32)
    mu = jnp.take(params["mlp_user_emb"], user_id, axis=0).astype(f32)
    mi = jnp.take(params["mlp_item_emb"], item_id, axis=0).astype(f32)
    gmf = gu * gi
    h = jnp.concatenate([mu, mi], axis=1)
    w1 = jnp.concatenate([params["w1u"], params["w1i"]], axis=0).astype(f32)
    h = jax.nn.relu(h @ w1 + params["b1"])
    h = jax.nn.relu(h @ params["w2"].astype(f32) + params["b2"])
    h = jax.nn.relu(h @ params["w3"].astype(f32) + params["b3"])
    feats = jnp.concatenate([gmf, h], axis=1)                 # (B, 80)
    w = jnp.concatenate([0.5 * params["gmf_out_w"],
                         0.5 * params["mlp_out_w"]], axis=1)  # (1, 80)
    return (feats @ w.T + params["out_bias"]).reshape(-1)


if __name__ == "__main__":
    key = jax.random.PRNGKey(0)
    k_params, k_u, k_i = jax.random.split(key, 3)

    user_num, item_num, batch = 50, 40, 8
    params = make_params(k_params, user_num, item_num)

    users = jax.random.randint(k_u, (batch, 1), 0, user_num, dtype=jnp.int32)
    items = jax.random.randint(k_i, (batch, 1), 0, item_num, dtype=jnp.int32)
    x = jnp.concatenate([users, items], axis=1)               # (8, 2) int32

    out = jax.block_until_ready(ncf_forward(params, x))
    ref = jax.block_until_ready(ncf_forward_ref(params, x))

    assert out.shape == (batch,)
    assert jnp.allclose(out, ref, atol=1e-2, rtol=1e-2), (out, ref)
    print("KERNEL_OK")
</pallas_src>

<mosaic_0001>
module attributes {stable_mosaic.version = 11 : i64} {
  func.func @ncf_kernel(%arg0: i32, %arg1: memref<16x64xbf16, #tpu.memory_space<vmem>>, %arg2: memref<16x64xbf16, #tpu.memory_space<vmem>>, %arg3: memref<16x64xbf16, #tpu.memory_space<vmem>>, %arg4: memref<16x64xbf16, #tpu.memory_space<vmem>>, %arg5: memref<64x64xbf16, #tpu.memory_space<vmem>>, %arg6: memref<64x64xbf16, #tpu.memory_space<vmem>>, %arg7: memref<1x64xf32, #tpu.memory_space<vmem>>, %arg8: memref<64x32xbf16, #tpu.memory_space<vmem>>, %arg9: memref<1x32xf32, #tpu.memory_space<vmem>>, %arg10: memref<32x16xbf16, #tpu.memory_space<vmem>>, %arg11: memref<1x16xf32, #tpu.memory_space<vmem>>, %arg12: memref<64x1xf32, #tpu.memory_space<vmem>>, %arg13: memref<16x1xf32, #tpu.memory_space<vmem>>, %arg14: memref<1x1xf32, #tpu.memory_space<vmem>>, %arg15: memref<16x1xf32, #tpu.memory_space<vmem>>) attributes {dimension_semantics = [#tpu.dimension_semantics<parallel>], iteration_bounds = array<i64: 1>, scalar_prefetch = 0 : i64, scratch_operands = 0 : i64, tpu.core_type = #tpu.core_type<tc>, window_params = [{transform_indices = @transform_0, window_bounds = array<i64: 16, 64>}, {transform_indices = @transform_1, window_bounds = array<i64: 16, 64>}, {transform_indices = @transform_2, window_bounds = array<i64: 16, 64>}, {transform_indices = @transform_3, window_bounds = array<i64: 16, 64>}, {pipeline_mode = #tpu.pipeline_mode<synchronous>, transform_indices = @transform_4, window_bounds = array<i64: 64, 64>}, {pipeline_mode = #tpu.pipeline_mode<synchronous>, transform_indices = @transform_5, window_bounds = array<i64: 64, 64>}, {pipeline_mode = #tpu.pipeline_mode<synchronous>, transform_indices = @transform_6, window_bounds = array<i64: 1, 64>}, {pipeline_mode = #tpu.pipeline_mode<synchronous>, transform_indices = @transform_7, window_bounds = array<i64: 64, 32>}, {pipeline_mode = #tpu.pipeline_mode<synchronous>, transform_indices = @transform_8, window_bounds = array<i64: 1, 32>}, {pipeline_mode = #tpu.pipeline_mode<synchronous>, transform_indices = @transform_9, window_bounds = array<i64: 32, 16>}, {pipeline_mode = #tpu.pipeline_mode<synchronous>, transform_indices = @transform_10, window_bounds = array<i64: 1, 16>}, {pipeline_mode = #tpu.pipeline_mode<synchronous>, transform_indices = @transform_11, window_bounds = array<i64: 64, 1>}, {pipeline_mode = #tpu.pipeline_mode<synchronous>, transform_indices = @transform_12, window_bounds = array<i64: 16, 1>}, {pipeline_mode = #tpu.pipeline_mode<synchronous>, transform_indices = @transform_13, window_bounds = array<i64: 1, 1>}, {transform_indices = @transform_14, window_bounds = array<i64: 16, 1>}]} {
    %c0 = arith.constant 0 : index
    %c0_0 = arith.constant 0 : index
    %0 = vector.load %arg1[%c0, %c0_0] : memref<16x64xbf16, #tpu.memory_space<vmem>>, vector<16x64xbf16>
    %1 = arith.extf %0 : vector<16x64xbf16> to vector<16x64xf32>
    %c0_1 = arith.constant 0 : index
    %c0_2 = arith.constant 0 : index
    %2 = vector.load %arg2[%c0_1, %c0_2] : memref<16x64xbf16, #tpu.memory_space<vmem>>, vector<16x64xbf16>
    %3 = arith.extf %2 : vector<16x64xbf16> to vector<16x64xf32>
    %4 = arith.mulf %1, %3 : vector<16x64xf32>
    %c0_3 = arith.constant 0 : index
    %c0_4 = arith.constant 0 : index
    %5 = vector.load %arg3[%c0_3, %c0_4] : memref<16x64xbf16, #tpu.memory_space<vmem>>, vector<16x64xbf16>
    %c0_5 = arith.constant 0 : index
    %c0_6 = arith.constant 0 : index
    %6 = vector.load %arg5[%c0_5, %c0_6] : memref<64x64xbf16, #tpu.memory_space<vmem>>, vector<64x64xbf16>
    %cst = arith.constant dense<0.000000e+00> : vector<16x64xf32>
    %7 = tpu.matmul %5, %6, %cst {dimension_numbers = #tpu.dot_dimension_numbers<[1], [0], [0], [1], [0, 0, 1, 1], [], []>} : vector<16x64xbf16>, vector<64x64xbf16>, vector<16x64xf32> -> vector<16x64xf32>
    %c0_7 = arith.constant 0 : index
    %c0_8 = arith.constant 0 : index
    %8 = vector.load %arg4[%c0_7, %c0_8] : memref<16x64xbf16, #tpu.memory_space<vmem>>, vector<16x64xbf16>
    %c0_9 = arith.constant 0 : index
    %c0_10 = arith.constant 0 : index
    %9 = vector.load %arg6[%c0_9, %c0_10] : memref<64x64xbf16, #tpu.memory_space<vmem>>, vector<64x64xbf16>
    %cst_11 = arith.constant dense<0.000000e+00> : vector<16x64xf32>
    %10 = tpu.matmul %8, %9, %cst_11 {dimension_numbers = #tpu.dot_dimension_numbers<[1], [0], [0], [1], [0, 0, 1, 1], [], []>} : vector<16x64xbf16>, vector<64x64xbf16>, vector<16x64xf32> -> vector<16x64xf32>
    %11 = arith.addf %7, %10 : vector<16x64xf32>
    %c0_12 = arith.constant 0 : index
    %c0_13 = arith.constant 0 : index
    %12 = vector.load %arg7[%c0_12, %c0_13] : memref<1x64xf32, #tpu.memory_space<vmem>>, vector<1x64xf32>
    %13 = vector.broadcast %12 : vector<1x64xf32> to vector<16x64xf32>
    %14 = arith.addf %11, %13 : vector<16x64xf32>
    %cst_14 = arith.constant 0.000000e+00 : f32
    %15 = vector.broadcast %cst_14 : f32 to vector<16x64xf32>
    %16 = arith.maximumf %14, %15 : vector<16x64xf32>
    %17 = arith.truncf %16 : vector<16x64xf32> to vector<16x64xbf16>
    %c0_15 = arith.constant 0 : index
    %c0_16 = arith.constant 0 : index
    %18 = vector.load %arg8[%c0_15, %c0_16] : memref<64x32xbf16, #tpu.memory_space<vmem>>, vector<64x32xbf16>
    %cst_17 = arith.constant dense<0.000000e+00> : vector<16x32xf32>
    %19 = tpu.matmul %17, %18, %cst_17 {dimension_numbers = #tpu.dot_dimension_numbers<[1], [0], [0], [1], [0, 0, 1, 1], [], []>} : vector<16x64xbf16>, vector<64x32xbf16>, vector<16x32xf32> -> vector<16x32xf32>
    %c0_18 = arith.constant 0 : index
    %c0_19 = arith.constant 0 : index
    %20 = vector.load %arg9[%c0_18, %c0_19] : memref<1x32xf32, #tpu.memory_space<vmem>>, vector<1x32xf32>
    %21 = vector.broadcast %20 : vector<1x32xf32> to vector<16x32xf32>
    %22 = arith.addf %19, %21 : vector<16x32xf32>
    %cst_20 = arith.constant 0.000000e+00 : f32
    %23 = vector.broadcast %cst_20 : f32 to vector<16x32xf32>
    %24 = arith.maximumf %22, %23 : vector<16x32xf32>
    %25 = arith.truncf %24 : vector<16x32xf32> to vector<16x32xbf16>
    %c0_21 = arith.constant 0 : index
    %c0_22 = arith.constant 0 : index
    %26 = vector.load %arg10[%c0_21, %c0_22] : memref<32x16xbf16, #tpu.memory_space<vmem>>, vector<32x16xbf16>
    %cst_23 = arith.constant dense<0.000000e+00> : vector<16x16xf32>
    %27 = tpu.matmul %25, %26, %cst_23 {dimension_numbers = #tpu.dot_dimension_numbers<[1], [0], [0], [1], [0, 0, 1, 1], [], []>} : vector<16x32xbf16>, vector<32x16xbf16>, vector<16x16xf32> -> vector<16x16xf32>
    %c0_24 = arith.constant 0 : index
    %c0_25 = arith.constant 0 : index
    %28 = vector.load %arg11[%c0_24, %c0_25] : memref<1x16xf32, #tpu.memory_space<vmem>>, vector<1x16xf32>
    %29 = vector.broadcast %28 : vector<1x16xf32> to vector<16x16xf32>
    %30 = arith.addf %27, %29 : vector<16x16xf32>
    %cst_26 = arith.constant 0.000000e+00 : f32
    %31 = vector.broadcast %cst_26 : f32 to vector<16x16xf32>
    %32 = arith.maximumf %30, %31 : vector<16x16xf32>
    %c0_27 = arith.constant 0 : index
    %c0_28 = arith.constant 0 : index
    %33 = vector.load %arg12[%c0_27, %c0_28] : memref<64x1xf32, #tpu.memory_space<vmem>>, vector<64x1xf32>
    %cst_29 = arith.constant dense<0.000000e+00> : vector<16x1xf32>
    %34 = tpu.matmul %4, %33, %cst_29 {dimension_numbers = #tpu.dot_dimension_numbers<[1], [0], [0], [1], [0, 0, 1, 1], [], []>} : vector<16x64xf32>, vector<64x1xf32>, vector<16x1xf32> -> vector<16x1xf32>
    %c0_30 = arith.constant 0 : index
    %c0_31 = arith.constant 0 : index
    %35 = vector.load %arg13[%c0_30, %c0_31] : memref<16x1xf32, #tpu.memory_space<vmem>>, vector<16x1xf32>
    %cst_32 = arith.constant dense<0.000000e+00> : vector<16x1xf32>
    %36 = tpu.matmul %32, %35, %cst_32 {dimension_numbers = #tpu.dot_dimension_numbers<[1], [0], [0], [1], [0, 0, 1, 1], [], []>} : vector<16x16xf32>, vector<16x1xf32>, vector<16x1xf32> -> vector<16x1xf32>
    %37 = arith.addf %34, %36 : vector<16x1xf32>
    %c0_33 = arith.constant 0 : index
    %c0_34 = arith.constant 0 : index
    %38 = vector.load %arg14[%c0_33, %c0_34] : memref<1x1xf32, #tpu.memory_space<vmem>>, vector<1x1xf32>
    %39 = vector.broadcast %38 : vector<1x1xf32> to vector<16x1xf32>
    %40 = arith.addf %37, %39 : vector<16x1xf32>
    %c0_35 = arith.constant 0 : index
    %c0_36 = arith.constant 0 : index
    %41 = vector.load %arg15[%c0_35, %c0_36] : memref<16x1xf32, #tpu.memory_space<vmem>>, vector<16x1xf32>
    tpu.vector_store %arg15[%c0_35, %c0_36], %40 {strides = array<i32>} : memref<16x1xf32, #tpu.memory_space<vmem>>, vector<16x1xf32>,
    return
  }
  func.func @transform_0(%arg0: i32) -> (i32, i32) {
    %c0_i32 = arith.constant 0 : i32
    %c0_i32_0 = arith.constant 0 : i32
    return %arg0, %c0_i32 : i32, i32
  }
  func.func @transform_1(%arg0: i32) -> (i32, i32) {
    %c0_i32 = arith.constant 0 : i32
    %c0_i32_0 = arith.constant 0 : i32
    return %arg0, %c0_i32 : i32, i32
  }
  func.func @transform_2(%arg0: i32) -> (i32, i32) {
    %c0_i32 = arith.constant 0 : i32
    %c0_i32_0 = arith.constant 0 : i32
    return %arg0, %c0_i32 : i32, i32
  }
  func.func @transform_3(%arg0: i32) -> (i32, i32) {
    %c0_i32 = arith.constant 0 : i32
    %c0_i32_0 = arith.constant 0 : i32
    return %arg0, %c0_i32 : i32, i32
  }
  func.func @transform_4(%arg0: i32) -> (i32, i32) {
    %c0_i32 = arith.constant 0 : i32
    %c0_i32_0 = arith.constant 0 : i32
    %c0_i32_1 = arith.constant 0 : i32
    return %c0_i32, %c0_i32_0 : i32, i32
  }
  func.func @transform_5(%arg0: i32) -> (i32, i32) {
    %c0_i32 = arith.constant 0 : i32
    %c0_i32_0 = arith.constant 0 : i32
    %c0_i32_1 = arith.constant 0 : i32
    return %c0_i32, %c0_i32_0 : i32, i32
  }
  func.func @transform_6(%arg0: i32) -> (i32, i32) {
    %c0_i32 = arith.constant 0 : i32
    %c0_i32_0 = arith.constant 0 : i32
    %c0_i32_1 = arith.constant 0 : i32
    return %c0_i32, %c0_i32_0 : i32, i32
  }
  func.func @transform_7(%arg0: i32) -> (i32, i32) {
    %c0_i32 = arith.constant 0 : i32
    %c0_i32_0 = arith.constant 0 : i32
    %c0_i32_1 = arith.constant 0 : i32
    return %c0_i32, %c0_i32_0 : i32, i32
  }
  func.func @transform_8(%arg0: i32) -> (i32, i32) {
    %c0_i32 = arith.constant 0 : i32
    %c0_i32_0 = arith.constant 0 : i32
    %c0_i32_1 = arith.constant 0 : i32
    return %c0_i32, %c0_i32_0 : i32, i32
  }
  func.func @transform_9(%arg0: i32) -> (i32, i32) {
    %c0_i32 = arith.constant 0 : i32
    %c0_i32_0 = arith.constant 0 : i32
    %c0_i32_1 = arith.constant 0 : i32
    return %c0_i32, %c0_i32_0 : i32, i32
  }
  func.func @transform_10(%arg0: i32) -> (i32, i32) {
    %c0_i32 = arith.constant 0 : i32
    %c0_i32_0 = arith.constant 0 : i32
    %c0_i32_1 = arith.constant 0 : i32
    return %c0_i32, %c0_i32_0 : i32, i32
  }
  func.func @transform_11(%arg0: i32) -> (i32, i32) {
    %c0_i32 = arith.constant 0 : i32
    %c0_i32_0 = arith.constant 0 : i32
    %c0_i32_1 = arith.constant 0 : i32
    return %c0_i32, %c0_i32_0 : i32, i32
  }
  func.func @transform_12(%arg0: i32) -> (i32, i32) {
    %c0_i32 = arith.constant 0 : i32
    %c0_i32_0 = arith.constant 0 : i32
    %c0_i32_1 = arith.constant 0 : i32
    return %c0_i32, %c0_i32_0 : i32, i32
  }
  func.func @transform_13(%arg0: i32) -> (i32, i32) {
    %c0_i32 = arith.constant 0 : i32
    %c0_i32_0 = arith.constant 0 : i32
    %c0_i32_1 = arith.constant 0 : i32
    return %c0_i32, %c0_i32_0 : i32, i32
  }
  func.func @transform_14(%arg0: i32) -> (i32, i32) {
    %c0_i32 = arith.constant 0 : i32
    %c0_i32_0 = arith.constant 0 : i32
    return %arg0, %c0_i32 : i32, i32
  }
}

</mosaic_0001>

<bundles_post_ra>
// kernel: ncf_forward.1
= control target key start
LH: loop header
LB: loop body
LE: loop exit
PB: predicated region body
PF: predicated region fallthrough
CT: control target
= control target key end

     0   :  { %v762_v0 = vmov 0.0   ;;  %vm763_vm0 = vmmov 0   ;;  %vm109_vm1 = vcmask 523264   ;;  %vm348_vm2 = vcmask 261120   ;;  %s968_s5 = inlined_call_operand.vmem [shape: bf16[64,64], index: 5, kind: input, shape index: {}]   ;;  %s969_s4 = inlined_call_operand.vmem [shape: bf16[64,64], index: 4, kind: input, shape index: {}]   ;;  %s970_s3 = inlined_call_operand.vmem [shape: bf16[16,64], index: 3, kind: input, shape index: {}]   ;;  %s971_s2 = inlined_call_operand.vmem [shape: bf16[16,64], index: 2, kind: input, shape index: {}]   ;;  %s972_s7 = inlined_call_operand.vmem [shape: bf16[64,32], index: 7, kind: input, shape index: {}]   ;;  %s973_s6 = inlined_call_operand.vmem [shape: f32[1,64], index: 6, kind: input, shape index: {}]   ;;  %s974_s9 = inlined_call_operand.vmem [shape: bf16[32,16], index: 9, kind: input, shape index: {}]   ;;  %s975_s11 = inlined_call_operand.vmem [shape: f32[64,1], index: 11, kind: input, shape index: {}]   ;;  %s976_s12 = inlined_call_operand.vmem [shape: f32[16,1], index: 12, kind: input, shape index: {}]   ;;  %s977_s8 = inlined_call_operand.vmem [shape: f32[1,32], index: 8, kind: input, shape index: {}]   ;;  %s978_s0 = inlined_call_operand.vmem [shape: bf16[16,64], index: 0, kind: input, shape index: {}]   ;;  %s979_s1 = inlined_call_operand.vmem [shape: bf16[16,64], index: 1, kind: input, shape index: {}]   ;;  %s980_s13 = inlined_call_operand.<no memory space> [shape: f32[1,1], index: 13, kind: input, shape index: {}]   ;;  %s981_s10 = inlined_call_operand.vmem [shape: f32[1,16], index: 10, kind: input, shape index: {}]   ;;  %s982_s14 = inlined_call_operand.vmem [shape: f32[16,1], index: 14, kind: output, shape index: {}]  }
   0x1   :  { %652 = vmatprep.subr.bf16.mxu0 %v762_v0  ;;  %664 = vmatprep.subr.bf16.mxu1 %v762_v0  ;;  %v746_v1 = vld [vmem:[%s968_s5] sm:$0xff]   ;;  %v748_v3 = vld [vmem:[%s968_s5 + $0x8] sm:$0xff]   ;;  %v750_v5 = vld [vmem:[%s968_s5 + $0x10] sm:$0xff]   ;;  %vm405_vm3 = vcmask 130048   ;;  %vm577_vm4 = vcmask 7168  }
   0x2   :  { %v747_v2 = vld [vmem:[%s969_s4] sm:$0xff]   ;;  %660 = vmatprep.mubr.msk.bf16.mxu0 %vm763_vm0, %v762_v0  ;;  %672 = vmatprep.mubr.msk.bf16.mxu1 %vm763_vm0, %v762_v0  ;;  %v749_v4 = vld [vmem:[%s969_s4 + $0x8] sm:$0xff]   ;;  %v751_v6 = vld [vmem:[%s969_s4 + $0x10] sm:$0xff]  }
   0x3   :  { %653 = vmatpush3.bf16.msra.mxu0 %v746_v1  ;;  %665 = vmatpush3.bf16.msra.mxu1 %v747_v2  ;;  %v752_v7 = vld [vmem:[%s968_s5 + $0x18] sm:$0xff]   ;;  %v754_v9 = vld [vmem:[%s970_s3] sm:$0xff]   ;;  %v757_v12 = vld [vmem:[%s972_s7 + $0x8] sm:$0xff]   ;;  %v19_v2 = vstv %s980_s13 }
   0x4   :  { %654 = vmatprep.subr.bf16.mxu0 %v762_v0  ;;  %666 = vmatprep.subr.bf16.mxu1 %v762_v0  ;;  %v753_v8 = vld [vmem:[%s969_s4 + $0x18] sm:$0xff]   ;;  %v755_v10 = vld [vmem:[%s971_s2] sm:$0xff]   ;;  %v758_v13 = vld [vmem:[%s972_s7 + $0x10] sm:$0xff]   ;;  %20 = vst [vmem:[#allocation2] sm:$0x1] %v19_v2 }
   0x5   :  { %v756_v11 = vld [vmem:[%s972_s7] sm:$0xff]   ;;  %v759_v14 = vld [vmem:[%s972_s7 + $0x18] sm:$0xff]   ;;  %v761_v32 = vld [vmem:[%s974_s9 + $0x8] sm:$0xff]  }
   0x6   :  { %v596_v17 = vld [vmem:[%s973_s6] ss:$0 sm:$0xff]  ;;  %v396_v34 = vld [vmem:[%s975_s11 + $0x8] sm:$0xff]  ;;  %v397_v46 = vld [vmem:[%s975_s11 + $0x10] sm:$0xff] }
   0x7   :  { %655 = vmatpush3.bf16.msra.mxu0 %v748_v3  ;;  %667 = vmatpush3.bf16.msra.mxu1 %v749_v4  ;;  %v760_v31 = vld [vmem:[%s974_s9] sm:$0xff]   ;;  %v404_v37 = vld [vmem:[%s976_s12 + $0x8] sm:$0xff]  ;;  %v398_v47 = vld [vmem:[%s975_s11 + $0x18] sm:$0xff] }
   0x8   :  { %656 = vmatprep.subr.bf16.mxu0 %v762_v0  ;;  %668 = vmatprep.subr.bf16.mxu1 %v762_v0  ;;  %v395_v33 = vld [vmem:[%s975_s11] sm:$0xff]  ;;  %v730_v51 = vpack.c.bf16 %v398_v47, %v397_v46  ;;  %v400_v53 = vld [vmem:[%s975_s11 + $0x28] sm:$0xff]  ;;  %v401_v55 = vld [vmem:[%s975_s11 + $0x30] sm:$0xff] }
   0x9   :  { %v726_v35 = vpack.c.bf16 %v396_v34, %v395_v33  ;;  %v403_v36 = vld [vmem:[%s976_s12] sm:$0xff]  ;;  %v402_v56 = vld [vmem:[%s975_s11 + $0x38] sm:$0xff] }
   0xa   :  { %v722_v38 = vpack.c.bf16 %v404_v37, %v403_v36  ;;  %v597_v39 = vld [vmem:[%s977_s8] ss:$0 sm:$0xff]  ;;  %v738_v57 = vpack.c.bf16 %v402_v56, %v401_v55 }
   0xb   :  { %657 = vmatpush3.bf16.msra.mxu0 %v750_v5  ;;  %669 = vmatpush3.bf16.msra.mxu1 %v751_v6  ;;  %v399_v52 = vld [vmem:[%s975_s11 + $0x20] sm:$0xff] }
   0xc   :  { %658 = vmatprep.subr.bf16.mxu0 %v762_v0  ;;  %670 = vmatprep.subr.bf16.mxu1 %v762_v0  ;;  %v734_v54 = vpack.c.bf16 %v400_v53, %v399_v52  ;;  %v613_v58 = vld [vmem:[%s978_s0] sm:$0xff]  }
   0xd   :  { %v617_v59 = vld [vmem:[%s979_s1] sm:$0xff]   ;;  %v614_v60 = vunpack.c.l.bf16 %v613_v58  ;;  %v615_v62 = vunpack.c.h.bf16 %v613_v58 }
   0xe   :  { %v618_v61 = vunpack.c.l.bf16 %v617_v59  ;;  %v619_v63 = vunpack.c.h.bf16 %v617_v59  ;;  %v603_v3 = vld [vmem:[%s981_s10] ss:$0 sm:$0xff] }
   0xf   :  { %659 = vmatpush3.bf16.msra.mxu0 %v752_v7  ;;  %671 = vmatpush3.bf16.msra.mxu1 %v753_v8 }
  0x10   :  { %676 = vmatprep.subr.bf16.mxu0 %v762_v0  ;;  %688 = vmatprep.subr.bf16.mxu1 %v762_v0  ;;  %v59_v1 = vmul.f32 %v619_v63, %v615_v62 }
  0x12   :  { %661 = vmatmul.mubr.msk.bf16.vlgmr.msra.gmra.mrb[0].mxu0 %vm109_vm1, %v754_v9  ;;  %673 = vmatmul.mubr.msk.bf16.vlgmr.msra.gmra.mrb[0].mxu1 %vm109_vm1, %v755_v10 }
  0x13   :  { %677 = vmatpush3.bf16.msra.mxu0 %v756_v11  ;;  %684 = vmatprep.mubr.msk.bf16.mxu0 %vm763_vm0, %v762_v0 }
  0x14   :  { %678 = vmatprep.subr.bf16.mxu0 %v762_v0  ;;  %692 = vmatprep.mubr.msk.bf16.mxu1 %vm763_vm0, %v762_v0 }
  0x15   :  { %689 = vmatpush3.bf16.msra.mxu1 %v760_v31 }
  0x16   :  { %690 = vmatprep.subr.bf16.mxu1 %v762_v0 }
  0x17   :  { %679 = vmatpush3.bf16.msra.mxu0 %v757_v12 }
  0x18   :  { %680 = vmatprep.subr.bf16.mxu0 %v762_v0 }
  0x19   :  { %691 = vmatpush3.bf16.msra.mxu1 %v761_v32 }
  0x1a   :  { %727 = vmatprep.subr.bf16.mxu1 %v726_v35 }
  0x1b   :  { %681 = vmatpush3.bf16.msra.mxu0 %v758_v13 }
  0x1c   :  { %682 = vmatprep.subr.bf16.mxu0 %v762_v0  ;;  %v58_v0 = vmul.f32 %v618_v61, %v614_v60 }
  0x1f   :  { %683 = vmatpush3.bf16.msra.mxu0 %v759_v14 }
  0x20   :  { %723 = vmatprep.subr.bf16.mxu0 %v722_v38 }
  0xe5   :  { %v147_v15 = vpop.f32.mrb[0].mxu0  ;;  %v220_v16 = vpop.f32.mrb[0].mxu1 }
  0xe6   :  { %v662_v18 = vpop.f32.mrb[1].mxu0  ;;  %v221_v19 = vadd.f32 %v220_v16, %v147_v15  ;;  %v674_v20 = vpop.f32.mrb[1].mxu1  ;;  %v611_v15 = vld [vmem:[#allocation2] ss:$0 sm:$0xff] }
  0xe7   :  { %v150_v21 = vpop.f32.mrb[2].mxu0  ;;  %v223_v22 = vpop.f32.mrb[2].mxu1 }
  0xe8   :  { %v663_v23 = vpop.f32.mrb[3].mxu0  ;;  %v234_v24 = vadd.f32 %v596_v17, %v221_v19  ;;  %v224_v25 = vadd.f32 %v223_v22, %v150_v21  ;;  %v675_v26 = vpop.f32.mrb[3].mxu1 }
  0xea   :  { %v235_v27 = vadd.f32 %v596_v17, %v224_v25  ;;  %v236_v28 = vmax.f32 %v234_v24, 0.0 }
  0xec   :  { %v237_v29 = vmax.f32 %v235_v27, 0.0 }
  0xee   :  { %v238_v30 = vpack.c.bf16 %v237_v29, %v236_v28 }
  0xf0   :  { %685 = vmatmul.mubr.msk.bf16.vlgmr.msra.gmra.mrb[4].mxu0 %vm109_vm1, %v238_v30 }
  0xf1   :  { %725 = vmatpush3.bf16.msra.mxu0 %v722_v38 }
 0x1c3   :  { %v315_v40 = vpop.f32.mrb[4].mxu0 }
 0x1c4   :  { %v316_v41 = vadd.f32 %v597_v39, %v315_v40  ;;  %v686_v42 = vpop.f32.mrb[5].mxu0 }
 0x1c5   :  { %v318_v43 = vpop.f32.mrb[6].mxu0 }
 0x1c6   :  { %v319_v44 = vadd.f32 %v597_v39, %v318_v43  ;;  %v687_v45 = vpop.f32.mrb[7].mxu0  ;;  %v322_v48 = vmax.f32 %v316_v41, 0.0 }
 0x1c8   :  { %v323_v49 = vmax.f32 %v319_v44, 0.0 }
 0x1ca   :  { %v324_v50 = vpack.c.bf16 %v323_v49, %v322_v48 }
 0x1cc   :  { %693 = vmatmul.mubr.msk.bf16.vlgmr.msra.gmra.mrb[4].mxu1 %vm348_vm2, %v324_v50 }
 0x1cd   :  { %729 = vmatpush3.bf16.msra.mxu1 %v726_v35  ;;  %719 = vmatprep.mubr.msk.f32.mxu1 %vm109_vm1, %v58_v0 }
 0x1ce   :  { %731 = vmatprep.subr.bf16.mxu1 %v730_v51 }
 0x1d1   :  { %733 = vmatpush3.bf16.msra.mxu1 %v730_v51 }
 0x1d2   :  { %735 = vmatprep.subr.bf16.mxu1 %v734_v54 }
 0x1d5   :  { %737 = vmatpush3.bf16.msra.mxu1 %v734_v54 }
 0x1d6   :  { %739 = vmatprep.subr.bf16.mxu1 %v738_v57 }
 0x1d9   :  { %741 = vmatpush3.bf16.msra.mxu1 %v738_v57 }
 0x1dc   :  { %720 = vmatmul.mubr.msk.f32.vlgmr.msra.gmra.mrb[8].mxu1 %vm109_vm1, %v59_v1 }
 0x29f   :  { %v386_v4 = vpop.f32.mrb[4].mxu1 }
 0x2a0   :  { %v387_v5 = vadd.f32 %v603_v3, %v386_v4  ;;  %v694_v6 = vpop.f32.mrb[5].mxu1 }
 0x2a1   :  { %v389_v7 = vpop.f32.mrb[6].mxu1 }
 0x2a2   :  { %v393_v8 = vmax.f32 %v387_v5, 0.0  ;;  %v390_v9 = vadd.f32 %v603_v3, %v389_v7  ;;  %v695_v10 = vpop.f32.mrb[7].mxu1 }
 0x2a4   :  { %v394_v11 = vmax.f32 %v390_v9, 0.0  ;;  %700 = vmatprep.mubr.msk.f32.mxu0 %vm405_vm3, %v393_v8 }
 0x2a6   :  { %701 = vmatmul.mubr.msk.f32.vlgmr.msra.gmra.mrb[8].mxu0 %vm405_vm3, %v394_v11 }
 0x2af   :  { %v721_v12 = vpop.f32.mrb[8].mxu1 }
 0x2b0   :  { %v559_v13 = vpop.f32.mrb[9].mxu1 }
 0x379   :  { %v702_v14 = vpop.f32.mrb[8].mxu0 }
 0x37a   :  { %v565_v16 = vadd.f32 %v721_v12, %v702_v14  ;;  %v478_v17 = vpop.f32.mrb[9].mxu0 }
 0x37b   :  { %v560_v18 = vadd.f32 %v559_v13, %v478_v17 }
 0x37c   :  { %v576_v19 = vadd.f32 %v611_v15, %v565_v16 }
 0x37d   :  { %v575_v20 = vadd.f32 %v611_v15, %v560_v18 }
 0x37e   :  { %579 = vst.msk [vmem:[%s982_s14 + $0x8] sm:$0xff] %vm577_vm4, %v576_v19 }
 0x37f   :  { %578 = vst.msk [vmem:[%s982_s14] sm:$0xff] %vm577_vm4, %v575_v20 }

</bundles_post_ra>
